<compile_context>
chip_gen: v7x
topology: tpu7x:2x2x1
jax: 0.10.0
libtpu: 0.0.40
codegen_flags: <defaults>
</compile_context>

<pallas_src>
import jax
import jax.numpy as jnp
from jax.experimental import pallas as pl
from jax.experimental.pallas import tpu as pltpu

BN_EPS = 1e-5


def fc_bn_relu_kernel(x_ref, w_ref, gamma_ref, beta_ref, o_ref):
    # Linear (bias omitted -- cancelled by batch-mean subtraction below).
    # (N, IN) @ (IN, TN) on the MXU with f32 accumulation.
    y = jnp.dot(x_ref[...], w_ref[...], preferred_element_type=jnp.float32)

    # BatchNorm1d with batch statistics (track_running_stats=False), biased var.
    n = y.shape[0]
    inv_n = 1.0 / n
    mean = jnp.sum(y, axis=0, keepdims=True) * inv_n          # (1, TN)
    diff = y - mean
    var = jnp.sum(diff * diff, axis=0, keepdims=True) * inv_n  # (1, TN), biased
    inv_std = jax.lax.rsqrt(var + BN_EPS)

    # Fold gamma into inv_std: only (1, TN)-sized math, then 2 full-tensor ops + ReLU.
    scale = gamma_ref[...] * inv_std                           # (1, TN)
    o_ref[...] = jnp.maximum(diff * scale + beta_ref[...], 0.0).astype(o_ref.dtype)


def prepare_params(w, gamma, beta):
    """One-time parameter prep (call OUTSIDE the per-step forward).

    w: (out_planes, in_planes) PyTorch nn.Linear layout.
    Returns weight transposed to (in_planes, out_padded) and gamma/beta as
    (1, out_padded), all zero-padded on OUT to a multiple of 128 so the kernel
    output is lane-dense. Zero-padded columns stay finite through BN and are
    sliced off after the kernel.
    """
    out_planes, _ = w.shape
    out_padded = ((out_planes + 127) // 128) * 128
    pad = out_padded - out_planes
    w_t = jnp.pad(jnp.asarray(w, jnp.float32).T, ((0, 0), (0, pad)))
    gamma_p = jnp.pad(jnp.asarray(gamma, jnp.float32).reshape(1, -1), ((0, 0), (0, pad)))
    beta_p = jnp.pad(jnp.asarray(beta, jnp.float32).reshape(1, -1), ((0, 0), (0, pad)))
    return w_t, gamma_p, beta_p


def fc_layer_forward(x, w_t, gamma_p, beta_p, out_planes):
    """x: (N, in_planes) f32; w_t/gamma_p/beta_p from prepare_params.
    Returns (N, out_planes) f32."""
    n, in_planes = x.shape
    out_padded = w_t.shape[1]

    # OUT tile: multiple of 128, capped at 256 (MXU-friendly on v6e/v7x,
    # still fine as 2x128 on v5e). Full OUT if it is small.
    tn = out_padded if out_padded <= 256 else 256
    if out_padded % tn != 0:
        tn = 128
    grid = (out_padded // tn,)

    out_p = pl.pallas_call(
        fc_bn_relu_kernel,
        out_shape=jax.ShapeDtypeStruct((n, out_padded), jnp.float32),
        grid_spec=pltpu.PrefetchScalarGridSpec(
            num_scalar_prefetch=0,
            grid=grid,
            in_specs=[
                pl.BlockSpec((n, in_planes), lambda j: (0, 0)),   # x replicated over OUT tiles
                pl.BlockSpec((in_planes, tn), lambda j: (0, j)),  # weight tile (pipelined)
                pl.BlockSpec((1, tn), lambda j: (0, j)),          # gamma tile
                pl.BlockSpec((1, tn), lambda j: (0, j)),          # beta tile
            ],
            out_specs=pl.BlockSpec((n, tn), lambda j: (0, j)),
        ),
        compiler_params=pltpu.CompilerParams(
            # OUT tiles are independent (BN is per-feature) -> parallel
            # (shards across both TensorCores on v7x).
            dimension_semantics=("parallel",)),
    )(x, w_t, gamma_p, beta_p)

    return out_p[:, :out_planes]


def reference_forward(x, w, b, gamma, beta):
    # Full PyTorch semantics including the Linear bias (which the kernel drops
    # because the batch-mean subtraction cancels it exactly).
    y = x @ w.T + b
    mean = jnp.mean(y, axis=0, keepdims=True)
    var = jnp.mean((y - mean) ** 2, axis=0, keepdims=True)
    y = (y - mean) / jnp.sqrt(var + BN_EPS) * gamma + beta
    return jnp.maximum(y, 0.0)


if __name__ == "__main__":
    key = jax.random.PRNGKey(0)
    n, in_planes, out_planes = 8, 32, 64

    kx, kw, kb, kg, kbe = jax.random.split(key, 5)
    x = jax.random.normal(kx, (n, in_planes), dtype=jnp.float32)

    # Deterministic parameter init (PyTorch-Linear-style uniform bound).
    bound = 1.0 / (in_planes ** 0.5)
    w = jax.random.uniform(kw, (out_planes, in_planes), jnp.float32, -bound, bound)
    b = jax.random.uniform(kb, (out_planes,), jnp.float32, -bound, bound)
    gamma = jnp.ones((out_planes,), jnp.float32) + 0.1 * jax.random.normal(kg, (out_planes,))
    beta = 0.1 * jax.random.normal(kbe, (out_planes,))

    # One-time prep: transpose weight + pad OUT to a lane-dense multiple of 128.
    w_t, gamma_p, beta_p = prepare_params(w, gamma, beta)

    out = fc_layer_forward(x, w_t, gamma_p, beta_p, out_planes)
    out = jax.block_until_ready(out)

    ref = reference_forward(x, w, b, gamma, beta)
    assert out.shape == (n, out_planes)
    assert bool(jnp.all(jnp.isfinite(out)))
    assert jnp.allclose(out, ref, atol=1e-4, rtol=1e-4)

    print("KERNEL_OK")
</pallas_src>

<mosaic_0001>
module attributes {stable_mosaic.version = 11 : i64} {
  func.func @fc_bn_relu_kernel(%arg0: i32, %arg1: memref<8x32xf32, #tpu.memory_space<vmem>>, %arg2: memref<32x128xf32, #tpu.memory_space<vmem>>, %arg3: memref<1x128xf32, #tpu.memory_space<vmem>>, %arg4: memref<1x128xf32, #tpu.memory_space<vmem>>, %arg5: memref<8x128xf32, #tpu.memory_space<vmem>>) attributes {dimension_semantics = [#tpu.dimension_semantics<parallel>], iteration_bounds = array<i64: 1>, scalar_prefetch = 0 : i64, scratch_operands = 0 : i64, tpu.core_type = #tpu.core_type<tc>, window_params = [{pipeline_mode = #tpu.pipeline_mode<synchronous>, transform_indices = @transform_0, window_bounds = array<i64: 8, 32>}, {transform_indices = @transform_1, window_bounds = array<i64: 32, 128>}, {transform_indices = @transform_2, window_bounds = array<i64: 1, 128>}, {transform_indices = @transform_3, window_bounds = array<i64: 1, 128>}, {transform_indices = @transform_4, window_bounds = array<i64: 8, 128>}]} {
    %c0 = arith.constant 0 : index
    %c0_0 = arith.constant 0 : index
    %0 = vector.load %arg1[%c0, %c0_0] : memref<8x32xf32, #tpu.memory_space<vmem>>, vector<8x32xf32>
    %c0_1 = arith.constant 0 : index
    %c0_2 = arith.constant 0 : index
    %1 = vector.load %arg2[%c0_1, %c0_2] : memref<32x128xf32, #tpu.memory_space<vmem>>, vector<32x128xf32>
    %cst = arith.constant dense<0.000000e+00> : vector<8x128xf32>
    %2 = tpu.matmul %0, %1, %cst {dimension_numbers = #tpu.dot_dimension_numbers<[1], [0], [0], [1], [0, 0, 1, 1], [], []>} : vector<8x32xf32>, vector<32x128xf32>, vector<8x128xf32> -> vector<8x128xf32>
    %cst_3 = arith.constant dense<0.000000e+00> : vector<128xf32>
    %3 = vector.multi_reduction <add>, %2, %cst_3 [0] : vector<8x128xf32> to vector<128xf32>
    %4 = vector.shape_cast %3 : vector<128xf32> to vector<1x128xf32>
    %cst_4 = arith.constant 1.250000e-01 : f32
    %5 = vector.broadcast %cst_4 : f32 to vector<1x128xf32>
    %6 = arith.mulf %4, %5 : vector<1x128xf32>
    %7 = vector.broadcast %6 : vector<1x128xf32> to vector<8x128xf32>
    %8 = arith.subf %2, %7 : vector<8x128xf32>
    %9 = arith.mulf %8, %8 : vector<8x128xf32>
    %cst_5 = arith.constant dense<0.000000e+00> : vector<128xf32>
    %10 = vector.multi_reduction <add>, %9, %cst_5 [0] : vector<8x128xf32> to vector<128xf32>
    %11 = vector.shape_cast %10 : vector<128xf32> to vector<1x128xf32>
    %cst_6 = arith.constant 1.250000e-01 : f32
    %12 = vector.broadcast %cst_6 : f32 to vector<1x128xf32>
    %13 = arith.mulf %11, %12 : vector<1x128xf32>
    %cst_7 = arith.constant 9.99999974E-6 : f32
    %14 = vector.broadcast %cst_7 : f32 to vector<1x128xf32>
    %15 = arith.addf %13, %14 : vector<1x128xf32>
    %16 = math.rsqrt %15 : vector<1x128xf32>
    %c0_8 = arith.constant 0 : index
    %c0_9 = arith.constant 0 : index
    %17 = vector.load %arg3[%c0_8, %c0_9] : memref<1x128xf32, #tpu.memory_space<vmem>>, vector<1x128xf32>
    %18 = arith.mulf %17, %16 : vector<1x128xf32>
    %19 = vector.broadcast %18 : vector<1x128xf32> to vector<8x128xf32>
    %20 = arith.mulf %8, %19 : vector<8x128xf32>
    %c0_10 = arith.constant 0 : index
    %c0_11 = arith.constant 0 : index
    %21 = vector.load %arg4[%c0_10, %c0_11] : memref<1x128xf32, #tpu.memory_space<vmem>>, vector<1x128xf32>
    %22 = vector.broadcast %21 : vector<1x128xf32> to vector<8x128xf32>
    %23 = arith.addf %20, %22 : vector<8x128xf32>
    %cst_12 = arith.constant 0.000000e+00 : f32
    %24 = vector.broadcast %cst_12 : f32 to vector<8x128xf32>
    %25 = arith.maximumf %23, %24 : vector<8x128xf32>
    %c0_13 = arith.constant 0 : index
    %c0_14 = arith.constant 0 : index
    %26 = vector.load %arg5[%c0_13, %c0_14] : memref<8x128xf32, #tpu.memory_space<vmem>>, vector<8x128xf32>
    tpu.vector_store %arg5[%c0_13, %c0_14], %25 {strides = array<i32>} : memref<8x128xf32, #tpu.memory_space<vmem>>, vector<8x128xf32>,
    return
  }
  func.func @transform_0(%arg0: i32) -> (i32, i32) {
    %c0_i32 = arith.constant 0 : i32
    %c0_i32_0 = arith.constant 0 : i32
    %c0_i32_1 = arith.constant 0 : i32
    return %c0_i32, %c0_i32_0 : i32, i32
  }
  func.func @transform_1(%arg0: i32) -> (i32, i32) {
    %c0_i32 = arith.constant 0 : i32
    %c0_i32_0 = arith.constant 0 : i32
    return %c0_i32, %arg0 : i32, i32
  }
  func.func @transform_2(%arg0: i32) -> (i32, i32) {
    %c0_i32 = arith.constant 0 : i32
    %c0_i32_0 = arith.constant 0 : i32
    return %c0_i32, %arg0 : i32, i32
  }
  func.func @transform_3(%arg0: i32) -> (i32, i32) {
    %c0_i32 = arith.constant 0 : i32
    %c0_i32_0 = arith.constant 0 : i32
    return %c0_i32, %arg0 : i32, i32
  }
  func.func @transform_4(%arg0: i32) -> (i32, i32) {
    %c0_i32 = arith.constant 0 : i32
    %c0_i32_0 = arith.constant 0 : i32
    return %c0_i32, %arg0 : i32, i32
  }
}

</mosaic_0001>

<bundles_post_ra>
// kernel: tpu_custom_call.1
= control target key start
LH: loop header
LB: loop body
LE: loop exit
PB: predicated region body
PF: predicated region fallthrough
CT: control target
= control target key end

     0   :  { %9 = vsyncpa [#allocation3], 0  ;;  %s364_s0 = inlined_call_operand.hbm [shape: f32[8,32], index: 0, kind: input, shape index: {}]   ;;  %s365_s1 = inlined_call_operand.hbm [shape: f32[32,128], index: 1, kind: input, shape index: {}]   ;;  %s366_s2 = inlined_call_operand.vmem [shape: f32[1,128], index: 2, kind: input, shape index: {}]   ;;  %s367_s3 = inlined_call_operand.vmem [shape: f32[1,128], index: 3, kind: input, shape index: {}]   ;;  %s368_s4 = inlined_call_operand.hbm [shape: f32[8,128], index: 4, kind: output, shape index: {}]  }
   0x1   :  { %10 = vsyncpa [#allocation6], 0 }
   0x2   :  { %11 = vsyncpa [#allocation4], 0  ;;  %s282_s15 = smov [#allocation2]   ;;  %s283_s17 = smov [#allocation5]  }
   0x3   :  { %s18_s16 = sshll.u32 %s282_s15, 4  ;;  %s27_s18 = sshll.u32 %s283_s17, 4  ;;  %s19_s16 = int_to_ptr.vmem [resolvable:$true] %s18_s16  ;;  %s315_s18 = int_to_ptr.vmem [resolvable:$true] %s27_s18 }
   0x4   :  { %s210_s21 = scalar_lea.hbm %s364_s0, 128 }
   0x5   :  { %p211_p0 = scmp.ne.s32.totalorder %s364_s0, %s210_s21  ;;  %p214_p1 = scmp.lt.u32.totalorder %s210_s21, %s364_s0 }
   0x7   :  { %p216_p2 = pnand %p214_p1, %p211_p0 }
   0x9   :  { %219 = shalt.err (!%p216_p2)
}
   0xa   :  { %s220_s26 = scalar_lea.vmem %s19_s16, 128  ;;  %p225_p4 = scmp.lt.s32.totalorder %s19_s16, %s19_s16 }
   0xb   :  { %p221_p3 = scmp.ne.s32.totalorder %s19_s16, %s220_s26  ;;  %p226_p5 = scmp.lt.s32.totalorder %s220_s26, %s220_s26 }
   0xd   :  { %p227_p6 = por %p226_p5, %p225_p4 }
   0xf   :  { %p228_p7 = pnand %p227_p6, %p221_p3 }
  0x11   :  { %231 = shalt.err (!%p228_p7)
}
  0x12   :  { %21 = dma.hbm_to_vmem [thread:$0]  %s364_s0, 128, %s19_s16, [#allocation3]  }
  0x13   :  { %s232_s5 = scalar_lea.hbm %s365_s1, 512 }
  0x14   :  { %p233_p8 = scmp.ne.s32.totalorder %s365_s1, %s232_s5  ;;  %p236_p9 = scmp.lt.u32.totalorder %s232_s5, %s365_s1 }
  0x16   :  { %p238_p10 = pnand %p236_p9, %p233_p8 }
  0x18   :  { %241 = shalt.err (!%p238_p10)
}
  0x19   :  { %s242_s10 = scalar_lea.vmem %s315_s18, 512  ;;  %p247_p12 = scmp.lt.s32.totalorder %s315_s18, %s315_s18 }
  0x1a   :  { %p243_p11 = scmp.ne.s32.totalorder %s315_s18, %s242_s10  ;;  %p248_p13 = scmp.lt.s32.totalorder %s242_s10, %s242_s10 }
  0x1c   :  { %p249_p0 = por %p248_p13, %p247_p12 }
  0x1e   :  { %p250_p1 = pnand %p249_p0, %p243_p11 }
  0x20   :  { %253 = shalt.err (!%p250_p1)
}
  0x21   :  { %s284_s0 = smov 128   ;;  %s285_s11 = smov 8  }
  0x22   :  { %33 = dma.hbm_to_vmem [thread:$0]  %s365_s1, 512, %s315_s18, [#allocation6], %s284_s0, %s284_s0, %s285_s11  }
  0x23   :  { %276 = dma.done.wait [#allocation3], 128  }
  0x24   :  { %277 = vsyncadd [#allocation3], 4294967168 }
  0x25   :  { %278 = dma.done.wait [#allocation6], 512  }
  0x26   :  { %279 = vsyncadd [#allocation6], 4294966784  ;;  %v286_v0 = vmov 0.0|0.0   ;;  %vm287_vm0 = vmmov 0   ;;  %v288_v1 = vmov 0.0   ;;  %v45_v2 = vld [vmem:[#allocation5] sm:$0xff]  ;;  %v144_v28 = vlaneseq }
  0x27   :  { %194 = vmatprep.subr.bf16.mxu0 %v286_v0  ;;  %191 = vmatprep.mubr.msk.f32.mxu0 %vm287_vm0, %v288_v1  ;;  %v46_v3 = vld [vmem:[#allocation5 + $0x8] sm:$0xff]  ;;  %v47_v4 = vld [vmem:[#allocation5 + $0x10] sm:$0xff]  ;;  %v48_v6 = vld [vmem:[#allocation5 + $0x18] sm:$0xff]  ;;  %vm49_vm1 = vcmask 261120   ;;  %s289_s17 = smov [#allocation7]  }
  0x28   :  { %v195_v5 = vpack.c.bf16 %v46_v3, %v45_v2  ;;  %v198_v7 = vpack.c.bf16 %v48_v6, %v47_v4  ;;  %v44_v8 = vld [vmem:[#allocation2] sm:$0xff]  ;;  %v145_v29 = vshrl.u32 %v144_v28, 7  ;;  %s166_s18 = sshll.u32 %s289_s17, 4  ;;  %s167_s18 = int_to_ptr.vmem [resolvable:$true] %s166_s18 }
  0x29   :  { %v141_v30 = vld [vmem:[%s366_s2] sm:$0x1]  ;;  %s254_s19 = scalar_lea.vmem %s167_s18, 128  ;;  %p259_p3 = scmp.lt.s32.totalorder %s167_s18, %s167_s18 }
  0x2a   :  { %196 = vmatpush3.bf16.msra.mxu0 %v195_v5  ;;  %v146_v31 = vsub.s32 0, %v145_v29  ;;  %v177_v35 = vld [vmem:[%s367_s3] ss:$0 sm:$0xff]  ;;  %p255_p2 = scmp.ne.s32.totalorder %s167_s18, %s254_s19  ;;  %p260_p4 = scmp.lt.s32.totalorder %s254_s19, %s254_s19 }
  0x2b   :  { %197 = vmatprep.subr.bf16.mxu0 %v286_v0 }
  0x2c   :  { %p261_p5 = por %p260_p4, %p259_p3 }
  0x2e   :  { %199 = vmatpush3.bf16.msra.mxu0 %v198_v7  ;;  %p262_p6 = pnand %p261_p5, %p255_p2 }
  0x31   :  { %192 = vmatmul.mubr.msk.f32.vlgmr.msra.gmra.mrb[0].mxu0 %vm49_vm1, %v44_v8 }
 0x104   :  { %v119_v9 = vpop.f32.mrb[0].mxu0 }
 0x105   :  { %v123_v10 = vrot.slane %v119_v9, 4  ;;  %v193_v11 = vpop.f32.mrb[1].mxu0 }
 0x107   :  { %v124_v12 = vadd.f32 %v123_v10, %v119_v9 }
 0x109   :  { %v125_v13 = vrot.slane %v124_v12, 2 }
 0x10b   :  { %v126_v14 = vadd.f32 %v125_v13, %v124_v12 }
 0x10d   :  { %v127_v15 = vrot.slane %v126_v14, 1 }
 0x10f   :  { %v128_v16 = vadd.f32 %v127_v15, %v126_v14 }
 0x111   :  { %v129_v17 = vmul.f32 0.125, %v128_v16 }
 0x113   :  { %v130_v18 = vsub.f32 %v119_v9, %v129_v17 }
 0x115   :  { %v131_v19 = vmul.f32 %v130_v18, %v130_v18 }
 0x117   :  { %v132_v20 = vrot.slane %v131_v19, 4 }
 0x119   :  { %v133_v21 = vadd.f32 %v132_v20, %v131_v19 }
 0x11b   :  { %v134_v22 = vrot.slane %v133_v21, 2 }
 0x11d   :  { %v135_v23 = vadd.f32 %v134_v22, %v133_v21 }
 0x11f   :  { %v136_v24 = vrot.slane %v135_v23, 1 }
 0x121   :  { %v137_v25 = vadd.f32 %v136_v24, %v135_v23 }
 0x123   :  { %v138_v26 = vmul.f32 0.125, %v137_v25 }
 0x125   :  { %v139_v27 = vadd.f32 1e-05, %v138_v26 }
 0x127   :  { %208 = vrsqrt.f32 %v139_v27 }
 0x131   :  { %v209_v32 = vpop.eup %208 }
 0x132   :  { %v142_v33 = vmul.f32 %v209_v32, %v141_v30 }
 0x134   :  { %v147_v34 = vrot.slane %v142_v33, %v146_v31 }
 0x136   :  { %v149_v36 = vmul.f32 %v147_v34, %v130_v18 }
 0x138   :  { %v157_v37 = vadd.f32 %v177_v35, %v149_v36 }
 0x13a   :  { %v158_v38 = vmax.f32 %v157_v37, 0.0 }
 0x13c   :  { %159 = vst [vmem:[#allocation7] sm:$0xff] %v158_v38 }
 0x13d   :  { %265 = shalt.err (!%p262_p6)
}
 0x13e   :  { %s266_s21 = scalar_lea.hbm %s368_s4, 128 }
 0x13f   :  { %p267_p7 = scmp.ne.s32.totalorder %s368_s4, %s266_s21  ;;  %p270_p8 = scmp.lt.u32.totalorder %s266_s21, %s368_s4 }
 0x141   :  { %p272_p9 = pnand %p270_p8, %p267_p7 }
 0x143   :  { %275 = shalt.err (!%p272_p9)
}
 0x144   :  { %169 = dma.vmem_to_hbm [thread:$0]  %s167_s18, 128, %s368_s4, [#allocation4]  }
 0x145   :  { %280 = dma.done.wait [#allocation4], 128  }
 0x146   :  { %281 = vsyncadd [#allocation4], 4294967168 }
 0x147   :  { %173 = vsyncpa [#allocation3], 1 }
 0x148   :  { %174 = vsyncpa [#allocation6], 1 }
 0x149   :  { %175 = vsyncpa [#allocation4], 1 }

</bundles_post_ra>
